<compile_context>
chip_gen: v6e
topology: v6e:2x2x1
jax: 0.10.0
libtpu: 0.0.40
codegen_flags: <defaults>
</compile_context>

<pallas_src>
import jax
import jax.numpy as jnp
from jax.experimental import pallas as pl
from jax.experimental.pallas import tpu as pltpu


LANE = 128


def _round_up(n, m):
    return ((n + m - 1) // m) * m


def _default_num_batch_tiles():
    """1 grid step on single-TC chips (v5e/v6e), 2 on v7x (2 TensorCores)."""
    try:
        kind = jax.devices()[0].device_kind.lower()
    except Exception:
        return 1
    return 2 if ("v7" in kind or "tpu7" in kind) else 1


def _make_ffnn_kernel(n_linear):
    """Fused Linear -> ReLU chain with a final sigmoid, all in f32."""

    def kernel(x_ref, w_ref, b_ref, o_ref):
        # x_ref: (TM, D) f32   w_ref: (L, D, D) f32   b_ref: (L, 1, D) f32
        h = x_ref[...]                                  # (TM, D) f32
        for i in range(n_linear):                       # static unroll
            if i > 0:
                h = jnp.maximum(h, 0.0)                 # ReLU between linears (VPU)
            w = w_ref[i]                                # (D, D), static slice
            b = b_ref[i]                                # (1, D), static slice
            h = jnp.dot(h, w, preferred_element_type=jnp.float32) + b
        # last_activation = Sigmoid (EUP), lane-dense f32 store.
        o_ref[...] = jax.nn.sigmoid(h).astype(o_ref.dtype)

    return kernel


def ffnn_forward(x, params, *, num_batch_tiles=None):
    """Fused FFNN forward.

    x:      (batch, input_size) float32
    params: list of (W, b), W shape (in_i, out_i), b shape (1, out_i), float32
    returns (batch, last_out) float32
    """
    batch, in_dim = x.shape
    n_linear = len(params)
    out_dim = params[-1][0].shape[1]

    # ---- one common padded feature dim D (multiple of 128 lanes) -----------
    dims = [in_dim] + [w.shape[1] for w, _ in params]
    d_max = _round_up(max(dims), LANE)

    # ---- coalesce all layers into one weight stack + one bias stack --------
    w_all = jnp.zeros((n_linear, d_max, d_max), jnp.float32)
    b_all = jnp.zeros((n_linear, 1, d_max), jnp.float32)
    for i, (w, b) in enumerate(params):
        kin, kout = w.shape
        w_all = w_all.at[i, :kin, :kout].set(w)
        b_all = b_all.at[i, 0, :kout].set(b.reshape(-1))

    # ---- batch tiling: pad to a multiple of 8*num_tiles, tm = pad/num_tiles
    if num_batch_tiles is None:
        num_batch_tiles = _default_num_batch_tiles()
    num_batch_tiles = max(1, int(num_batch_tiles))
    batch_pad = _round_up(batch, 8 * num_batch_tiles)
    tm = batch_pad // num_batch_tiles
    x_p = jnp.zeros((batch_pad, d_max), jnp.float32).at[:batch, :in_dim].set(x)

    grid = (num_batch_tiles,)
    in_specs = [
        pl.BlockSpec((tm, d_max), lambda i: (i, 0)),                       # x tile
        pl.BlockSpec((n_linear, d_max, d_max), lambda i: (0, 0, 0)),       # weights, resident
        pl.BlockSpec((n_linear, 1, d_max), lambda i: (0, 0, 0)),           # biases, resident
    ]
    out_specs = pl.BlockSpec((tm, d_max), lambda i: (i, 0))

    # ---- advisory cost estimate for XLA scheduling --------------------------
    itemsize = 4
    flops = 2 * batch_pad * n_linear * d_max * d_max
    bytes_accessed = (x_p.size + w_all.size + b_all.size
                      + batch_pad * d_max) * itemsize
    transcendentals = batch_pad * d_max  # final sigmoid

    out_p = pl.pallas_call(
        _make_ffnn_kernel(n_linear),
        out_shape=jax.ShapeDtypeStruct((batch_pad, d_max), jnp.float32),
        grid=grid,
        in_specs=in_specs,
        out_specs=out_specs,
        compiler_params=pltpu.CompilerParams(
            dimension_semantics=("parallel",),
            vmem_limit_bytes=32 * 1024 * 1024),
        cost_estimate=pl.CostEstimate(
            flops=flops,
            transcendentals=transcendentals,
            bytes_accessed=bytes_accessed),
    )(x_p, w_all, b_all)

    return out_p[:batch, :out_dim]


def init_params(key, input_size, layers, last_number_of_nodes):
    """Deterministic init matching nn.Linear default: U(-1/sqrt(fan_in), +)."""
    dims = [input_size] + list(layers) + [last_number_of_nodes]
    params = []
    for i in range(len(dims) - 1):
        fan_in, fan_out = dims[i], dims[i + 1]
        key, kw, kb = jax.random.split(key, 3)
        bound = 1.0 / (fan_in ** 0.5)
        w = jax.random.uniform(kw, (fan_in, fan_out), jnp.float32,
                               minval=-bound, maxval=bound)
        b = jax.random.uniform(kb, (1, fan_out), jnp.float32,
                               minval=-bound, maxval=bound)
        params.append((w, b))
    return params


def ffnn_reference(x, params):
    """Pure-JAX f32 reference of the same forward pass."""
    h = x
    for i, (w, b) in enumerate(params):
        if i > 0:
            h = jnp.maximum(h, 0.0)
        h = h @ w + b
    return jax.nn.sigmoid(h)


if __name__ == "__main__":
    # FFNN(input_size=32, layers=[64, 32], last_number_of_nodes=3)
    batch = 300                     # not a multiple of 8 -> exercises padding
    input_size = 32
    layers = [64, 32]
    last_number_of_nodes = 3

    key = jax.random.PRNGKey(0)
    key, kx = jax.random.split(key)
    x = jax.random.normal(kx, (batch, input_size), jnp.float32)
    params = init_params(key, input_size, layers, last_number_of_nodes)

    out = ffnn_forward(x, params)
    out = jax.block_until_ready(out)

    ref = ffnn_reference(x, params)
    assert out.shape == (batch, last_number_of_nodes)
    # Full f32 path now -> tight tolerance vs the f32 reference.
    assert jnp.allclose(out, ref, atol=1e-4, rtol=1e-4), (
        float(jnp.max(jnp.abs(out - ref))))

    print("KERNEL_OK")
</pallas_src>

<mosaic_0001>
module attributes {stable_mosaic.version = 11 : i64} {
  func.func @kernel(%arg0: i32, %arg1: memref<304x128xf32, #tpu.memory_space<vmem>>, %arg2: memref<3x128x128xf32, #tpu.memory_space<vmem>>, %arg3: memref<3x1x128xf32, #tpu.memory_space<vmem>>, %arg4: memref<304x128xf32, #tpu.memory_space<vmem>>) attributes {dimension_semantics = [#tpu.dimension_semantics<parallel>], iteration_bounds = array<i64: 1>, scalar_prefetch = 0 : i64, scratch_operands = 0 : i64, tpu.core_type = #tpu.core_type<tc>, window_params = [{transform_indices = @transform_0, window_bounds = array<i64: 304, 128>}, {pipeline_mode = #tpu.pipeline_mode<synchronous>, transform_indices = @transform_1, window_bounds = array<i64: 3, 128, 128>}, {pipeline_mode = #tpu.pipeline_mode<synchronous>, transform_indices = @transform_2, window_bounds = array<i64: 3, 1, 128>}, {transform_indices = @transform_3, window_bounds = array<i64: 304, 128>}]} {
    %c0 = arith.constant 0 : index
    %c0_0 = arith.constant 0 : index
    %0 = vector.load %arg1[%c0, %c0_0] : memref<304x128xf32, #tpu.memory_space<vmem>>, vector<304x128xf32>
    %c0_1 = arith.constant 0 : index
    %c0_2 = arith.constant 0 : index
    %c0_3 = arith.constant 0 : index
    %1 = vector.load %arg2[%c0_1, %c0_2, %c0_3] : memref<3x128x128xf32, #tpu.memory_space<vmem>>, vector<1x128x128xf32>
    %2 = vector.shape_cast %1 : vector<1x128x128xf32> to vector<128x128xf32>
    %c0_4 = arith.constant 0 : index
    %c0_5 = arith.constant 0 : index
    %c0_6 = arith.constant 0 : index
    %3 = vector.load %arg3[%c0_4, %c0_5, %c0_6] : memref<3x1x128xf32, #tpu.memory_space<vmem>>, vector<1x1x128xf32>
    %4 = vector.shape_cast %3 : vector<1x1x128xf32> to vector<1x128xf32>
    %cst = arith.constant dense<0.000000e+00> : vector<304x128xf32>
    %5 = tpu.matmul %0, %2, %cst {dimension_numbers = #tpu.dot_dimension_numbers<[1], [0], [0], [1], [0, 0, 1, 1], [], []>} : vector<304x128xf32>, vector<128x128xf32>, vector<304x128xf32> -> vector<304x128xf32>
    %6 = vector.broadcast %4 : vector<1x128xf32> to vector<304x128xf32>
    %7 = arith.addf %5, %6 : vector<304x128xf32>
    %cst_7 = arith.constant 0.000000e+00 : f32
    %8 = vector.broadcast %cst_7 : f32 to vector<304x128xf32>
    %9 = arith.maximumf %7, %8 : vector<304x128xf32>
    %c1 = arith.constant 1 : index
    %c0_8 = arith.constant 0 : index
    %c0_9 = arith.constant 0 : index
    %10 = vector.load %arg2[%c1, %c0_8, %c0_9] : memref<3x128x128xf32, #tpu.memory_space<vmem>>, vector<1x128x128xf32>
    %11 = vector.shape_cast %10 : vector<1x128x128xf32> to vector<128x128xf32>
    %c1_10 = arith.constant 1 : index
    %c0_11 = arith.constant 0 : index
    %c0_12 = arith.constant 0 : index
    %12 = vector.load %arg3[%c1_10, %c0_11, %c0_12] : memref<3x1x128xf32, #tpu.memory_space<vmem>>, vector<1x1x128xf32>
    %13 = vector.shape_cast %12 : vector<1x1x128xf32> to vector<1x128xf32>
    %cst_13 = arith.constant dense<0.000000e+00> : vector<304x128xf32>
    %14 = tpu.matmul %9, %11, %cst_13 {dimension_numbers = #tpu.dot_dimension_numbers<[1], [0], [0], [1], [0, 0, 1, 1], [], []>} : vector<304x128xf32>, vector<128x128xf32>, vector<304x128xf32> -> vector<304x128xf32>
    %15 = vector.broadcast %13 : vector<1x128xf32> to vector<304x128xf32>
    %16 = arith.addf %14, %15 : vector<304x128xf32>
    %cst_14 = arith.constant 0.000000e+00 : f32
    %17 = vector.broadcast %cst_14 : f32 to vector<304x128xf32>
    %18 = arith.maximumf %16, %17 : vector<304x128xf32>
    %c2 = arith.constant 2 : index
    %c0_15 = arith.constant 0 : index
    %c0_16 = arith.constant 0 : index
    %19 = vector.load %arg2[%c2, %c0_15, %c0_16] : memref<3x128x128xf32, #tpu.memory_space<vmem>>, vector<1x128x128xf32>
    %20 = vector.shape_cast %19 : vector<1x128x128xf32> to vector<128x128xf32>
    %c2_17 = arith.constant 2 : index
    %c0_18 = arith.constant 0 : index
    %c0_19 = arith.constant 0 : index
    %21 = vector.load %arg3[%c2_17, %c0_18, %c0_19] : memref<3x1x128xf32, #tpu.memory_space<vmem>>, vector<1x1x128xf32>
    %22 = vector.shape_cast %21 : vector<1x1x128xf32> to vector<1x128xf32>
    %cst_20 = arith.constant dense<0.000000e+00> : vector<304x128xf32>
    %23 = tpu.matmul %18, %20, %cst_20 {dimension_numbers = #tpu.dot_dimension_numbers<[1], [0], [0], [1], [0, 0, 1, 1], [], []>} : vector<304x128xf32>, vector<128x128xf32>, vector<304x128xf32> -> vector<304x128xf32>
    %24 = vector.broadcast %22 : vector<1x128xf32> to vector<304x128xf32>
    %25 = arith.addf %23, %24 : vector<304x128xf32>
    %26 = arith.negf %25 : vector<304x128xf32>
    %27 = math.exp %26 : vector<304x128xf32>
    %cst_21 = arith.constant 1.000000e+00 : f32
    %28 = vector.broadcast %cst_21 : f32 to vector<304x128xf32>
    %29 = arith.addf %28, %27 : vector<304x128xf32>
    %30 = arith.divf %28, %29 : vector<304x128xf32>
    %c0_22 = arith.constant 0 : index
    %c0_23 = arith.constant 0 : index
    %31 = vector.load %arg4[%c0_22, %c0_23] : memref<304x128xf32, #tpu.memory_space<vmem>>, vector<304x128xf32>
    tpu.vector_store %arg4[%c0_22, %c0_23], %30 {strides = array<i32>} : memref<304x128xf32, #tpu.memory_space<vmem>>, vector<304x128xf32>,
    return
  }
  func.func @transform_0(%arg0: i32) -> (i32, i32) {
    %c0_i32 = arith.constant 0 : i32
    %c0_i32_0 = arith.constant 0 : i32
    return %arg0, %c0_i32 : i32, i32
  }
  func.func @transform_1(%arg0: i32) -> (i32, i32, i32) {
    %c0_i32 = arith.constant 0 : i32
    %c0_i32_0 = arith.constant 0 : i32
    %c0_i32_1 = arith.constant 0 : i32
    %c0_i32_2 = arith.constant 0 : i32
    return %c0_i32, %c0_i32_0, %c0_i32_1 : i32, i32, i32
  }
  func.func @transform_2(%arg0: i32) -> (i32, i32, i32) {
    %c0_i32 = arith.constant 0 : i32
    %c0_i32_0 = arith.constant 0 : i32
    %c0_i32_1 = arith.constant 0 : i32
    %c0_i32_2 = arith.constant 0 : i32
    return %c0_i32, %c0_i32_0, %c0_i32_1 : i32, i32, i32
  }
  func.func @transform_3(%arg0: i32) -> (i32, i32) {
    %c0_i32 = arith.constant 0 : i32
    %c0_i32_0 = arith.constant 0 : i32
    return %arg0, %c0_i32 : i32, i32
  }
}

</mosaic_0001>

<bundles_post_ra>
// kernel: tpu_custom_call.1
= control target key start
LH: loop header
LB: loop body
LE: loop exit
PB: predicated region body
PF: predicated region fallthrough
CT: control target
= control target key end

     0   :  { %8 = vsyncpa [#allocation3], 0  ;;  %s2196_s0 = inlined_call_operand.hbm [shape: f32[304,128], index: 0, kind: input, shape index: {}]   ;;  %s2197_s1 = inlined_call_operand.hbm [shape: f32[3,128,128], index: 1, kind: input, shape index: {}]   ;;  %s2198_s2 = inlined_call_operand.vmem [shape: f32[3,1,128], index: 2, kind: input, shape index: {}]   ;;  %s2199_s3 = inlined_call_operand.hbm [shape: f32[304,128], index: 3, kind: output, shape index: {}]  }
   0x1   :  { %9 = vsyncpa [#allocation6], 0 }
   0x2   :  { %10 = vsyncpa [#allocation4], 0  ;;  %s2006_s12 = smov [#allocation2]  }
   0x3   :  { %s16_s13 = sshll.u32 %s2006_s12, 4  ;;  %s17_s13 = int_to_ptr.vmem [resolvable:$true] %s16_s13 }
   0x4   :  { %s1948_s14 = scalar_lea.vmem %s17_s13, 4864  ;;  %p1953_p1 = scmp.lt.s32.totalorder %s17_s13, %s17_s13 }
   0x5   :  { %p1949_p0 = scmp.ne.s32.totalorder %s17_s13, %s1948_s14  ;;  %p1954_p2 = scmp.lt.s32.totalorder %s1948_s14, %s1948_s14 }
   0x7   :  { %p1955_p3 = por %p1954_p2, %p1953_p1 }
   0x9   :  { %p1956_p4 = pnand %p1955_p3, %p1949_p0 }
   0xb   :  { %1959 = shalt.err (!%p1956_p4)
}
   0xc   :  { %s2007_s15 = smov 128   ;;  %s2008_s16 = smov 8  }
   0xd   :  { %22 = dma.hbm_to_vmem [thread:$0]  %s2196_s0, 4864, %s17_s13, [#allocation3], %s2007_s15, %s2007_s15, %s2008_s16  }
   0xe   :  { %s2009_s19 = smov [#allocation5]  }
   0xf   :  { %s28_s20 = sshll.u32 %s2009_s19, 4  ;;  %s29_s20 = int_to_ptr.vmem [resolvable:$true] %s28_s20 }
  0x10   :  { %s1968_s21 = scalar_lea.vmem %s29_s20, 6144  ;;  %p1973_p6 = scmp.lt.s32.totalorder %s29_s20, %s29_s20 }
  0x11   :  { %p1969_p5 = scmp.ne.s32.totalorder %s29_s20, %s1968_s21  ;;  %p1974_p7 = scmp.lt.s32.totalorder %s1968_s21, %s1968_s21 }
  0x13   :  { %p1975_p8 = por %p1974_p7, %p1973_p6 }
  0x15   :  { %p1976_p9 = pnand %p1975_p8, %p1969_p5 }
  0x17   :  { %1979 = shalt.err (!%p1976_p9)
}
  0x18   :  { %34 = dma.hbm_to_vmem [thread:$0]  %s2197_s1, 6144, %s29_s20, [#allocation6], %s2007_s15, %s2007_s15, %s2008_s16  }
  0x19   :  { %2000 = dma.done.wait [#allocation3], 4864  }
  0x1a   :  { %2001 = vsyncadd [#allocation3], 4294962432 }
  0x1b   :  { %2002 = dma.done.wait [#allocation6], 6144  }
  0x1c   :  { %2003 = vsyncadd [#allocation6], 4294961152  ;;  %v96_v0 = vld [vmem:[#allocation5 + $0x78] sm:$0xff]  ;;  %v95_v1 = vld [vmem:[#allocation5 + $0x70] sm:$0xff] }
  0x1d   :  { %1484 = vmatprep.subr.mxu0 %v96_v0  ;;  %1751 = vmatprep.subr.mxu1 %v96_v0  ;;  %v94_v2 = vld [vmem:[#allocation5 + $0x68] sm:$0xff]  ;;  %v93_v3 = vld [vmem:[#allocation5 + $0x60] sm:$0xff]  ;;  %v43_v4 = vld [vmem:[#allocation2] sm:$0xff] }
  0x1e   :  { %1485 = vmatpush3.msra.mxu0 %v96_v0  ;;  %1767 = vmatpush3.msra.mxu1 %v96_v0  ;;  %v92_v5 = vld [vmem:[#allocation5 + $0x58] sm:$0xff]  ;;  %v91_v6 = vld [vmem:[#allocation5 + $0x50] sm:$0xff]  ;;  %v90_v7 = vld [vmem:[#allocation5 + $0x48] sm:$0xff] }
  0x1f   :  { %1486 = vmatprep.subr.mxu0 %v95_v1  ;;  %1752 = vmatprep.subr.mxu1 %v95_v1  ;;  %v89_v8 = vld [vmem:[#allocation5 + $0x40] sm:$0xff]  ;;  %v88_v9 = vld [vmem:[#allocation5 + $0x38] sm:$0xff]  ;;  %v87_v10 = vld [vmem:[#allocation5 + $0x30] sm:$0xff] }
  0x20   :  { %1487 = vmatpush3.msra.mxu0 %v95_v1  ;;  %1768 = vmatpush3.msra.mxu1 %v95_v1  ;;  %v86_v11 = vld [vmem:[#allocation5 + $0x28] sm:$0xff]  ;;  %v85_v12 = vld [vmem:[#allocation5 + $0x20] sm:$0xff]  ;;  %v84_v13 = vld [vmem:[#allocation5 + $0x18] sm:$0xff] }
  0x21   :  { %1488 = vmatprep.subr.mxu0 %v94_v2  ;;  %1753 = vmatprep.subr.mxu1 %v94_v2  ;;  %v83_v14 = vld [vmem:[#allocation5 + $0x10] sm:$0xff]  ;;  %v82_v15 = vld [vmem:[#allocation5 + $0x8] sm:$0xff]  ;;  %v81_v16 = vld [vmem:[#allocation5] sm:$0xff] }
  0x22   :  { %1489 = vmatpush3.msra.mxu0 %v94_v2  ;;  %1516 = vmatprep.mubr.f32.mxu0 %v43_v4  ;;  %v44_v17 = vld [vmem:[#allocation2 + $0x8] sm:$0xff]  ;;  %v45_v18 = vld [vmem:[#allocation2 + $0x10] sm:$0xff]  ;;  %v63_v19 = vld [vmem:[#allocation2 + $0xa0] sm:$0xff] }
  0x23   :  { %1490 = vmatprep.subr.mxu0 %v93_v3  ;;  %1769 = vmatpush3.msra.mxu1 %v94_v2  ;;  %v64_v20 = vld [vmem:[#allocation2 + $0xa8] sm:$0xff]  ;;  %v65_v22 = vld [vmem:[#allocation2 + $0xb0] sm:$0xff]  ;;  %v46_v23 = vld [vmem:[#allocation2 + $0x18] sm:$0xff] }
  0x24   :  { %1491 = vmatpush3.msra.mxu0 %v93_v3  ;;  %1754 = vmatprep.subr.mxu1 %v93_v3  ;;  %v413_v21 = vld [vmem:[#allocation5 + $0xf8] sm:$0xff]  ;;  %v412_v24 = vld [vmem:[#allocation5 + $0xf0] sm:$0xff]  ;;  %v66_v26 = vld [vmem:[#allocation2 + $0xb8] sm:$0xff] }
  0x25   :  { %1492 = vmatprep.subr.mxu0 %v92_v5  ;;  %1770 = vmatpush3.msra.mxu1 %v93_v3  ;;  %v47_v25 = vld [vmem:[#allocation2 + $0x20] sm:$0xff]  ;;  %v411_v27 = vld [vmem:[#allocation5 + $0xe8] sm:$0xff]  ;;  %v48_v29 = vld [vmem:[#allocation2 + $0x28] sm:$0xff] }
  0x26   :  { %1493 = vmatpush3.msra.mxu0 %v92_v5  ;;  %1755 = vmatprep.subr.mxu1 %v92_v5  ;;  %v67_v28 = vld [vmem:[#allocation2 + $0xc0] sm:$0xff]  ;;  %v410_v30 = vld [vmem:[#allocation5 + $0xe0] sm:$0xff]  ;;  %v68_v32 = vld [vmem:[#allocation2 + $0xc8] sm:$0xff] }
  0x27   :  { %1494 = vmatprep.subr.mxu0 %v91_v6  ;;  %1771 = vmatpush3.msra.mxu1 %v92_v5  ;;  %v49_v31 = vld [vmem:[#allocation2 + $0x30] sm:$0xff]  ;;  %v409_v33 = vld [vmem:[#allocation5 + $0xd8] sm:$0xff]  ;;  %v50_v35 = vld [vmem:[#allocation2 + $0x38] sm:$0xff] }
  0x28   :  { %1495 = vmatpush3.msra.mxu0 %v91_v6  ;;  %1756 = vmatprep.subr.mxu1 %v91_v6  ;;  %v69_v34 = vld [vmem:[#allocation2 + $0xd0] sm:$0xff]  ;;  %v408_v36 = vld [vmem:[#allocation5 + $0xd0] sm:$0xff]  ;;  %v70_v38 = vld [vmem:[#allocation2 + $0xd8] sm:$0xff] }
  0x29   :  { %1496 = vmatprep.subr.mxu0 %v90_v7  ;;  %1772 = vmatpush3.msra.mxu1 %v91_v6  ;;  %v51_v37 = vld [vmem:[#allocation2 + $0x40] sm:$0xff]  ;;  %v407_v39 = vld [vmem:[#allocation5 + $0xc8] sm:$0xff]  ;;  %v52_v41 = vld [vmem:[#allocation2 + $0x48] sm:$0xff] }
  0x2a   :  { %1497 = vmatpush3.msra.mxu0 %v90_v7  ;;  %1757 = vmatprep.subr.mxu1 %v90_v7  ;;  %v71_v40 = vld [vmem:[#allocation2 + $0xe0] sm:$0xff]  ;;  %v406_v42 = vld [vmem:[#allocation5 + $0xc0] sm:$0xff]  ;;  %v72_v44 = vld [vmem:[#allocation2 + $0xe8] sm:$0xff] }
  0x2b   :  { %1498 = vmatprep.subr.mxu0 %v89_v8  ;;  %1773 = vmatpush3.msra.mxu1 %v90_v7  ;;  %v53_v43 = vld [vmem:[#allocation2 + $0x50] sm:$0xff]  ;;  %v405_v45 = vld [vmem:[#allocation5 + $0xb8] sm:$0xff]  ;;  %v54_v47 = vld [vmem:[#allocation2 + $0x58] sm:$0xff] }
  0x2c   :  { %1499 = vmatpush3.msra.mxu0 %v89_v8  ;;  %1758 = vmatprep.subr.mxu1 %v89_v8  ;;  %v73_v46 = vld [vmem:[#allocation2 + $0xf0] sm:$0xff]  ;;  %v404_v48 = vld [vmem:[#allocation5 + $0xb0] sm:$0xff]  ;;  %v74_v50 = vld [vmem:[#allocation2 + $0xf8] sm:$0xff] }
  0x2d   :  { %1500 = vmatprep.subr.mxu0 %v88_v9  ;;  %1774 = vmatpush3.msra.mxu1 %v89_v8  ;;  %v55_v49 = vld [vmem:[#allocation2 + $0x60] sm:$0xff]  ;;  %v403_v51 = vld [vmem:[#allocation5 + $0xa8] sm:$0xff]  ;;  %v56_v53 = vld [vmem:[#allocation2 + $0x68] sm:$0xff] }
  0x2e   :  { %1501 = vmatpush3.msra.mxu0 %v88_v9  ;;  %1759 = vmatprep.subr.mxu1 %v88_v9  ;;  %v75_v52 = vld [vmem:[#allocation2 + $0x100] sm:$0xff]  ;;  %v402_v54 = vld [vmem:[#allocation5 + $0xa0] sm:$0xff]  ;;  %v76_v56 = vld [vmem:[#allocation2 + $0x108] sm:$0xff] }
  0x2f   :  { %1502 = vmatprep.subr.mxu0 %v87_v10  ;;  %1775 = vmatpush3.msra.mxu1 %v88_v9  ;;  %v57_v55 = vld [vmem:[#allocation2 + $0x70] sm:$0xff]  ;;  %v401_v57 = vld [vmem:[#allocation5 + $0x98] sm:$0xff]  ;;  %v58_v59 = vld [vmem:[#allocation2 + $0x78] sm:$0xff] }
  0x30   :  { %1503 = vmatpush3.msra.mxu0 %v87_v10  ;;  %1760 = vmatprep.subr.mxu1 %v87_v10  ;;  %v77_v58 = vld [vmem:[#allocation2 + $0x110] sm:$0xff]  ;;  %v59_v60 = vld [vmem:[#allocation2 + $0x80] sm:$0xff]  ;;  %v78_v61 = vld [vmem:[#allocation2 + $0x118] sm:$0xff] }
  0x31   :  { %1504 = vmatprep.subr.mxu0 %v86_v11  ;;  %1776 = vmatpush3.msra.mxu1 %v87_v10  ;;  %v79_v62 = vld [vmem:[#allocation2 + $0x120] sm:$0xff]  ;;  %v60_v63 = vld [vmem:[#allocation2 + $0x88] sm:$0xff]  ;;  %v61_v0 = vld [vmem:[#allocation2 + $0x90] sm:$0xff] }
  0x32   :  { %1505 = vmatpush3.msra.mxu0 %v86_v11  ;;  %1761 = vmatprep.subr.mxu1 %v86_v11  ;;  %v80_v1 = vld [vmem:[#allocation2 + $0x128] sm:$0xff]  ;;  %v62_v2 = vld [vmem:[#allocation2 + $0x98] sm:$0xff]  ;;  %v400_v3 = vld [vmem:[#allocation5 + $0x90] sm:$0xff] }
  0x33   :  { %1506 = vmatprep.subr.mxu0 %v85_v12  ;;  %1777 = vmatpush3.msra.mxu1 %v86_v11  ;;  %v399_v4 = vld [vmem:[#allocation5 + $0x88] sm:$0xff]  ;;  %v398_v5 = vld [vmem:[#allocation5 + $0x80] sm:$0xff]  ;;  %v731_v6 = vld [vmem:[#allocation5 + $0x178] sm:$0xff] }
  0x34   :  { %1507 = vmatpush3.msra.mxu0 %v85_v12  ;;  %1762 = vmatprep.subr.mxu1 %v85_v12  ;;  %v730_v7 = vld [vmem:[#allocation5 + $0x170] sm:$0xff]  ;;  %v729_v8 = vld [vmem:[#allocation5 + $0x168] sm:$0xff]  ;;  %v728_v9 = vld [vmem:[#allocation5 + $0x160] sm:$0xff] }
  0x35   :  { %1508 = vmatprep.subr.mxu0 %v84_v13  ;;  %1778 = vmatpush3.msra.mxu1 %v85_v12  ;;  %v727_v10 = vld [vmem:[#allocation5 + $0x158] sm:$0xff]  ;;  %v726_v11 = vld [vmem:[#allocation5 + $0x150] sm:$0xff]  ;;  %v725_v12 = vld [vmem:[#allocation5 + $0x148] sm:$0xff] }
  0x36   :  { %1509 = vmatpush3.msra.mxu0 %v84_v13  ;;  %1763 = vmatprep.subr.mxu1 %v84_v13 }
  0x37   :  { %1510 = vmatprep.subr.mxu0 %v83_v14  ;;  %1779 = vmatpush3.msra.mxu1 %v84_v13  ;;  %v724_v13 = vld [vmem:[#allocation5 + $0x140] sm:$0xff] }
  0x38   :  { %1511 = vmatpush3.msra.mxu0 %v83_v14  ;;  %1764 = vmatprep.subr.mxu1 %v83_v14 }
  0x39   :  { %1512 = vmatprep.subr.mxu0 %v82_v15  ;;  %1780 = vmatpush3.msra.mxu1 %v83_v14  ;;  %v723_v14 = vld [vmem:[#allocation5 + $0x138] sm:$0xff] }
  0x3a   :  { %1513 = vmatpush3.msra.mxu0 %v82_v15  ;;  %1765 = vmatprep.subr.mxu1 %v82_v15 }
  0x3b   :  { %1514 = vmatprep.subr.mxu0 %v81_v16  ;;  %1781 = vmatpush3.msra.mxu1 %v82_v15  ;;  %v722_v15 = vld [vmem:[#allocation5 + $0x130] sm:$0xff] }
  0x3c   :  { %1515 = vmatpush3.msra.mxu0 %v81_v16  ;;  %1766 = vmatprep.subr.mxu1 %v81_v16 }
  0x3d   :  { %1517 = vmatmul.mubr.f32.vlgmr.msra.gmra.mxu0 %v44_v17  ;;  %1782 = vmatpush3.msra.mxu1 %v81_v16  ;;  %v721_v16 = vld [vmem:[#allocation5 + $0x128] sm:$0xff]  ;;  %v720_v17 = vld [vmem:[#allocation5 + $0x120] sm:$0xff] }
  0x3e   :  { %1519 = vmatprep.mubr.f32.mxu0 %v45_v18  ;;  %1546 = vmatprep.mubr.f32.mxu1 %v63_v19  ;;  %v719_v18 = vld [vmem:[#allocation5 + $0x118] sm:$0xff]  ;;  %v2046_v19 = vld [vmem:[%s2198_s2] ss:$0 sm:$0xff] }
  0x3f   :  { %1547 = vmatmul.mubr.f32.vlgmr.msra.gmra.mxu1 %v64_v20  ;;  %1573 = vmatprep.subr.mxu1 %v413_v21 }
  0x40   :  { %1549 = vmatprep.mubr.f32.mxu1 %v65_v22  ;;  %1574 = vmatpush3.msra.mxu1 %v413_v21 }
  0x41   :  { %1520 = vmatmul.mubr.f32.gmra.mxu0 %v46_v23  ;;  %1575 = vmatprep.subr.mxu1 %v412_v24 }
  0x42   :  { %1522 = vmatprep.mubr.f32.mxu0 %v47_v25  ;;  %1576 = vmatpush3.msra.mxu1 %v412_v24 }
  0x43   :  { %1550 = vmatmul.mubr.f32.gmra.mxu1 %v66_v26  ;;  %1577 = vmatprep.subr.mxu1 %v411_v27 }
  0x44   :  { %1552 = vmatprep.mubr.f32.mxu1 %v67_v28  ;;  %1578 = vmatpush3.msra.mxu1 %v411_v27 }
  0x45   :  { %1523 = vmatmul.mubr.f32.gmra.mxu0 %v48_v29  ;;  %1579 = vmatprep.subr.mxu1 %v410_v30 }
  0x46   :  { %1525 = vmatprep.mubr.f32.mxu0 %v49_v31  ;;  %1580 = vmatpush3.msra.mxu1 %v410_v30 }
  0x47   :  { %1553 = vmatmul.mubr.f32.gmra.mxu1 %v68_v32  ;;  %1581 = vmatprep.subr.mxu1 %v409_v33 }
  0x48   :  { %1555 = vmatprep.mubr.f32.mxu1 %v69_v34  ;;  %1582 = vmatpush3.msra.mxu1 %v409_v33 }
  0x49   :  { %1526 = vmatmul.mubr.f32.gmra.mxu0 %v50_v35  ;;  %1583 = vmatprep.subr.mxu1 %v408_v36 }
  0x4a   :  { %1528 = vmatprep.mubr.f32.mxu0 %v51_v37  ;;  %1584 = vmatpush3.msra.mxu1 %v408_v36 }
  0x4b   :  { %1556 = vmatmul.mubr.f32.gmra.mxu1 %v70_v38  ;;  %1585 = vmatprep.subr.mxu1 %v407_v39 }
  0x4c   :  { %1558 = vmatprep.mubr.f32.mxu1 %v71_v40  ;;  %1586 = vmatpush3.msra.mxu1 %v407_v39 }
  0x4d   :  { %1529 = vmatmul.mubr.f32.gmra.mxu0 %v52_v41  ;;  %1587 = vmatprep.subr.mxu1 %v406_v42 }
  0x4e   :  { %1531 = vmatprep.mubr.f32.mxu0 %v53_v43  ;;  %1588 = vmatpush3.msra.mxu1 %v406_v42 }
  0x4f   :  { %1559 = vmatmul.mubr.f32.gmra.mxu1 %v72_v44  ;;  %1589 = vmatprep.subr.mxu1 %v405_v45 }
  0x50   :  { %1561 = vmatprep.mubr.f32.mxu1 %v73_v46  ;;  %1590 = vmatpush3.msra.mxu1 %v405_v45 }
  0x51   :  { %1532 = vmatmul.mubr.f32.gmra.mxu0 %v54_v47  ;;  %1591 = vmatprep.subr.mxu1 %v404_v48 }
  0x52   :  { %1534 = vmatprep.mubr.f32.mxu0 %v55_v49  ;;  %1592 = vmatpush3.msra.mxu1 %v404_v48 }
  0x53   :  { %1562 = vmatmul.mubr.f32.gmra.mxu1 %v74_v50  ;;  %1593 = vmatprep.subr.mxu1 %v403_v51 }
  0x54   :  { %1564 = vmatprep.mubr.f32.mxu1 %v75_v52  ;;  %1594 = vmatpush3.msra.mxu1 %v403_v51 }
  0x55   :  { %1535 = vmatmul.mubr.f32.gmra.mxu0 %v56_v53  ;;  %1595 = vmatprep.subr.mxu1 %v402_v54 }
  0x56   :  { %1537 = vmatprep.mubr.f32.mxu0 %v57_v55  ;;  %1596 = vmatpush3.msra.mxu1 %v402_v54 }
  0x57   :  { %1565 = vmatmul.mubr.f32.gmra.mxu1 %v76_v56  ;;  %1597 = vmatprep.subr.mxu1 %v401_v57 }
  0x58   :  { %1567 = vmatprep.mubr.f32.mxu1 %v77_v58  ;;  %1598 = vmatpush3.msra.mxu1 %v401_v57 }
  0x59   :  { %1538 = vmatmul.mubr.f32.gmra.mxu0 %v58_v59  ;;  %1599 = vmatprep.subr.mxu1 %v400_v3 }
  0x5a   :  { %1540 = vmatprep.mubr.f32.mxu0 %v59_v60  ;;  %1600 = vmatpush3.msra.mxu1 %v400_v3 }
  0x5b   :  { %1568 = vmatmul.mubr.f32.gmra.mxu1 %v78_v61  ;;  %1601 = vmatprep.subr.mxu1 %v399_v4 }
  0x5c   :  { %1570 = vmatprep.mubr.f32.mxu1 %v79_v62  ;;  %1602 = vmatpush3.msra.mxu1 %v399_v4 }
  0x5d   :  { %1541 = vmatmul.mubr.f32.gmra.mxu0 %v60_v63  ;;  %1603 = vmatprep.subr.mxu1 %v398_v5 }
  0x5e   :  { %1543 = vmatprep.mubr.f32.mxu0 %v61_v0  ;;  %1604 = vmatpush3.msra.mxu1 %v398_v5 }
  0x5f   :  { %1571 = vmatmul.mubr.f32.gmra.mxu1 %v80_v1  ;;  %1662 = vmatprep.subr.mxu0 %v731_v6 }
  0x60   :  { %1663 = vmatpush3.msra.mxu0 %v731_v6 }
  0x61   :  { %1544 = vmatmul.mubr.f32.gmra.mxu0 %v62_v2  ;;  %1664 = vmatprep.subr.mxu0 %v730_v7 }
  0x62   :  { %1665 = vmatpush3.msra.mxu0 %v730_v7 }
  0x63   :  { %1666 = vmatprep.subr.mxu0 %v729_v8 }
  0x64   :  { %1667 = vmatpush3.msra.mxu0 %v729_v8 }
  0x65   :  { %1668 = vmatprep.subr.mxu0 %v728_v9 }
  0x66   :  { %1669 = vmatpush3.msra.mxu0 %v728_v9 }
  0x67   :  { %1670 = vmatprep.subr.mxu0 %v727_v10 }
  0x68   :  { %1671 = vmatpush3.msra.mxu0 %v727_v10 }
  0x69   :  { %1672 = vmatprep.subr.mxu0 %v726_v11 }
  0x6a   :  { %1673 = vmatpush3.msra.mxu0 %v726_v11 }
  0x6b   :  { %1674 = vmatprep.subr.mxu0 %v725_v12 }
  0x6c   :  { %1675 = vmatpush3.msra.mxu0 %v725_v12 }
  0x6d   :  { %1676 = vmatprep.subr.mxu0 %v724_v13 }
  0x6e   :  { %1677 = vmatpush3.msra.mxu0 %v724_v13 }
  0x6f   :  { %1678 = vmatprep.subr.mxu0 %v723_v14 }
  0x70   :  { %1679 = vmatpush3.msra.mxu0 %v723_v14 }
  0x71   :  { %1680 = vmatprep.subr.mxu0 %v722_v15 }
  0x72   :  { %1681 = vmatpush3.msra.mxu0 %v722_v15 }
  0x73   :  { %1682 = vmatprep.subr.mxu0 %v721_v16 }
  0x74   :  { %1683 = vmatpush3.msra.mxu0 %v721_v16 }
  0x75   :  { %1684 = vmatprep.subr.mxu0 %v720_v17 }
  0x76   :  { %1685 = vmatpush3.msra.mxu0 %v720_v17 }
  0x77   :  { %1686 = vmatprep.subr.mxu0 %v719_v18 }
  0x78   :  { %1687 = vmatpush3.msra.mxu0 %v719_v18 }
  0xfd   :  { %v1518_v20 = vpop.f32.mrf.mxu0 }
  0xfe   :  { %v176_v21 = vadd.f32 %v1518_v20, %v2046_v19 }
  0xff   :  { %v170_v22 = vpop.f32.mrf.mxu0  ;;  %v2049_v23 = vpop.f32.mrf.mxu1 }
 0x100   :  { %v171_v24 = vadd.f32 %v2046_v19, %v170_v22  ;;  %v360_v28 = vmax.f32 %v176_v21, 0.0 }
 0x101   :  { %v1521_v25 = vpop.f32.mrf.mxu0  ;;  %v2052_v26 = vpop.f32.mrf.mxu1 }
 0x102   :  { %v359_v27 = vmax.f32 %v171_v24, 0.0  ;;  %v186_v29 = vadd.f32 %v1521_v25, %v2046_v19  ;;  %v271_v21 = vadd.f32 %v2046_v19, %v2052_v26 }
 0x103   :  { %v180_v30 = vpop.f32.mrf.mxu0  ;;  %v2055_v31 = vpop.f32.mrf.mxu1 }
 0x104   :  { %v181_v32 = vadd.f32 %v2046_v19, %v180_v30  ;;  %1605 = vmatprep.mubr.f32.mxu1 %v359_v27  ;;  %v362_v35 = vmax.f32 %v186_v29, 0.0  ;;  %v379_v30 = vmax.f32 %v271_v21, 0.0 }
 0x105   :  { %v1524_v33 = vpop.f32.mrf.mxu0  ;;  %1606 = vmatmul.mubr.f32.vlgmr.msra.gmra.mxu1 %v360_v28  ;;  %v2059_v38 = vpop.f32.mrf.mxu1 }
 0x106   :  { %v361_v34 = vmax.f32 %v181_v32, 0.0  ;;  %v196_v36 = vadd.f32 %v1524_v33, %v2046_v19  ;;  %v281_v32 = vadd.f32 %v2046_v19, %v2059_v38 }
 0x107   :  { %v190_v37 = vpop.f32.mrf.mxu0  ;;  %v2063_v45 = vpop.f32.mrf.mxu1 }
 0x108   :  { %v191_v39 = vadd.f32 %v2046_v19, %v190_v37  ;;  %1608 = vmatprep.mubr.f32.mxu1 %v361_v34  ;;  %v364_v42 = vmax.f32 %v196_v36, 0.0  ;;  %v276_v34 = vadd.f32 %v2049_v23, %v2046_v19  ;;  %v381_v26 = vmax.f32 %v281_v32, 0.0 }
 0x109   :  { %v1527_v40 = vpop.f32.mrf.mxu0  ;;  %1609 = vmatmul.mubr.f32.gmra.mxu1 %v362_v35  ;;  %v290_v52 = vpop.f32.mrf.mxu1  ;;  %v296_v23 = vadd.f32 %v2063_v45, %v2046_v19 }
 0x10a   :  { %v363_v41 = vmax.f32 %v191_v39, 0.0  ;;  %v206_v43 = vadd.f32 %v1527_v40, %v2046_v19  ;;  %v291_v36 = vadd.f32 %v2046_v19, %v290_v52  ;;  %v380_v37 = vmax.f32 %v276_v34, 0.0 }
 0x10b   :  { %v200_v44 = vpop.f32.mrf.mxu0  ;;  %v2069_v59 = vpop.f32.mrf.mxu1  ;;  %v286_v39 = vadd.f32 %v2055_v31, %v2046_v19 }
 0x10c   :  { %v201_v46 = vadd.f32 %v2046_v19, %v200_v44  ;;  %1611 = vmatprep.mubr.f32.mxu1 %v363_v41  ;;  %v366_v49 = vmax.f32 %v206_v43, 0.0  ;;  %v383_v41 = vmax.f32 %v291_v36, 0.0  ;;  %v306_v31 = vadd.f32 %v2069_v59, %v2046_v19 }
 0x10d   :  { %v1530_v47 = vpop.f32.mrf.mxu0  ;;  %1612 = vmatmul.mubr.f32.gmra.mxu1 %v364_v42  ;;  %v300_v2 = vpop.f32.mrf.mxu1  ;;  %v382_v42 = vmax.f32 %v286_v39, 0.0 }
 0x10e   :  { %v365_v48 = vmax.f32 %v201_v46, 0.0  ;;  %v216_v50 = vadd.f32 %v1530_v47, %v2046_v19  ;;  %v301_v38 = vadd.f32 %v2046_v19, %v300_v2  ;;  %v384_v47 = vmax.f32 %v296_v23, 0.0 }
 0x10f   :  { %v210_v51 = vpop.f32.mrf.mxu0  ;;  %v1560_v9 = vpop.f32.mrf.mxu1 }
 0x110   :  { %v211_v53 = vadd.f32 %v2046_v19, %v210_v51  ;;  %1614 = vmatprep.mubr.f32.mxu1 %v365_v48  ;;  %v368_v56 = vmax.f32 %v216_v50, 0.0  ;;  %v385_v44 = vmax.f32 %v301_v38, 0.0  ;;  %v386_v51 = vmax.f32 %v306_v31, 0.0 }
 0x111   :  { %v1533_v54 = vpop.f32.mrf.mxu0  ;;  %1615 = vmatmul.mubr.f32.gmra.mxu1 %v366_v49  ;;  %v310_v16 = vpop.f32.mrf.mxu1  ;;  %v316_v52 = vadd.f32 %v1560_v9, %v2046_v19 }
 0x112   :  { %v367_v55 = vmax.f32 %v211_v53, 0.0  ;;  %v226_v57 = vadd.f32 %v1533_v54, %v2046_v19  ;;  %v311_v46 = vadd.f32 %v2046_v19, %v310_v16 }
 0x113   :  { %v220_v58 = vpop.f32.mrf.mxu0  ;;  %v1563_v27 = vpop.f32.mrf.mxu1 }
 0x114   :  { %v221_v60 = vadd.f32 %v2046_v19, %v220_v58  ;;  %1617 = vmatprep.mubr.f32.mxu1 %v367_v55  ;;  %v370_v63 = vmax.f32 %v226_v57, 0.0  ;;  %v387_v49 = vmax.f32 %v311_v46, 0.0  ;;  %v388_v55 = vmax.f32 %v316_v52, 0.0 }
 0x115   :  { %v1536_v61 = vpop.f32.mrf.mxu0  ;;  %1618 = vmatmul.mubr.f32.gmra.mxu1 %v368_v56  ;;  %v320_v35 = vpop.f32.mrf.mxu1  ;;  %v326_v56 = vadd.f32 %v1563_v27, %v2046_v19 }
 0x116   :  { %v369_v62 = vmax.f32 %v221_v60, 0.0  ;;  %v236_v0 = vadd.f32 %v1536_v61, %v2046_v19  ;;  %v321_v50 = vadd.f32 %v2046_v19, %v320_v35 }
 0x117   :  { %v230_v1 = vpop.f32.mrf.mxu0  ;;  %v1566_v40 = vpop.f32.mrf.mxu1  ;;  %v390_v60 = vmax.f32 %v326_v56, 0.0 }
 0x118   :  { %v231_v3 = vadd.f32 %v2046_v19, %v230_v1  ;;  %1620 = vmatprep.mubr.f32.mxu1 %v369_v62  ;;  %v372_v6 = vmax.f32 %v236_v0, 0.0  ;;  %v389_v53 = vmax.f32 %v321_v50, 0.0  ;;  %v336_v61 = vadd.f32 %v1566_v40, %v2046_v19 }
 0x119   :  { %v1539_v4 = vpop.f32.mrf.mxu0  ;;  %1621 = vmatmul.mubr.f32.gmra.mxu1 %v370_v63  ;;  %v330_v43 = vpop.f32.mrf.mxu1 }
 0x11a   :  { %v371_v5 = vmax.f32 %v231_v3, 0.0  ;;  %v246_v7 = vadd.f32 %v1539_v4, %v2046_v19  ;;  %v331_v54 = vadd.f32 %v2046_v19, %v330_v43  ;;  %v392_v1 = vmax.f32 %v336_v61, 0.0  ;;  %v718_v4 = vld [vmem:[#allocation5 + $0x110] sm:$0xff] }
 0x11b   :  { %v240_v8 = vpop.f32.mrf.mxu0  ;;  %v1569_v48 = vpop.f32.mrf.mxu1  ;;  %1688 = vmatprep.subr.mxu0 %v718_v4 }
 0x11c   :  { %v241_v10 = vadd.f32 %v2046_v19, %v240_v8  ;;  %1623 = vmatprep.mubr.f32.mxu1 %v371_v5  ;;  %v374_v13 = vmax.f32 %v246_v7, 0.0  ;;  %v391_v58 = vmax.f32 %v331_v54, 0.0  ;;  %v346_v2 = vadd.f32 %v1569_v48, %v2046_v19  ;;  %1689 = vmatpush3.msra.mxu0 %v718_v4  ;;  %v717_v7 = vld [vmem:[#allocation5 + $0x108] sm:$0xff]  ;;  %v716_v8 = vld [vmem:[#allocation5 + $0x100] sm:$0xff] }
 0x11d   :  { %v1542_v11 = vpop.f32.mrf.mxu0  ;;  %1624 = vmatmul.mubr.f32.gmra.mxu1 %v372_v6  ;;  %v340_v45 = vpop.f32.mrf.mxu1  ;;  %1690 = vmatprep.subr.mxu0 %v717_v7 }
 0x11e   :  { %v373_v12 = vmax.f32 %v241_v10, 0.0  ;;  %v256_v14 = vadd.f32 %v1542_v11, %v2046_v19  ;;  %v341_v59 = vadd.f32 %v2046_v19, %v340_v45  ;;  %v394_v5 = vmax.f32 %v346_v2, 0.0  ;;  %1691 = vmatpush3.msra.mxu0 %v717_v7  ;;  %v2107_v10 = vld [vmem:[%s2198_s2 + $0x1] ss:$0 sm:$0xff] }
 0x11f   :  { %v250_v15 = vpop.f32.mrf.mxu0  ;;  %v1572_v57 = vpop.f32.mrf.mxu1  ;;  %1692 = vmatprep.subr.mxu0 %v716_v8 }
 0x120   :  { %v251_v17 = vadd.f32 %v2046_v19, %v250_v15  ;;  %1626 = vmatprep.mubr.f32.mxu1 %v373_v12  ;;  %v376_v22 = vmax.f32 %v256_v14, 0.0  ;;  %v393_v63 = vmax.f32 %v341_v59, 0.0  ;;  %v356_v6 = vadd.f32 %v1572_v57, %v2046_v19  ;;  %1693 = vmatpush3.msra.mxu0 %v716_v8 }
 0x121   :  { %v1545_v18 = vpop.f32.mrf.mxu0  ;;  %1627 = vmatmul.mubr.f32.gmra.mxu1 %v374_v13  ;;  %v350_v62 = vpop.f32.mrf.mxu1 }
 0x122   :  { %v375_v20 = vmax.f32 %v251_v17, 0.0  ;;  %v266_v24 = vadd.f32 %v1545_v18, %v2046_v19  ;;  %v351_v0 = vadd.f32 %v2046_v19, %v350_v62  ;;  %v396_v9 = vmax.f32 %v356_v6, 0.0 }
 0x123   :  { %v260_v25 = vpop.f32.mrf.mxu0 }
 0x124   :  { %v261_v28 = vadd.f32 %v2046_v19, %v260_v25  ;;  %1629 = vmatprep.mubr.f32.mxu1 %v375_v20  ;;  %v378_v33 = vmax.f32 %v266_v24, 0.0  ;;  %v395_v3 = vmax.f32 %v351_v0, 0.0 }
 0x125   :  { %1630 = vmatmul.mubr.f32.gmra.mxu1 %v376_v22 }
 0x126   :  { %v377_v29 = vmax.f32 %v261_v28, 0.0 }
 0x128   :  { %1632 = vmatprep.mubr.f32.mxu1 %v377_v29 }
 0x129   :  { %1633 = vmatmul.mubr.f32.gmra.mxu1 %v378_v33 }
 0x12a   :  { %1635 = vmatprep.mubr.f32.mxu1 %v379_v30 }
 0x12d   :  { %1636 = vmatmul.mubr.f32.gmra.mxu1 %v380_v37 }
 0x12e   :  { %1638 = vmatprep.mubr.f32.mxu1 %v381_v26 }
 0x131   :  { %1639 = vmatmul.mubr.f32.gmra.mxu1 %v382_v42 }
 0x132   :  { %1641 = vmatprep.mubr.f32.mxu1 %v383_v41 }
 0x135   :  { %1642 = vmatmul.mubr.f32.gmra.mxu1 %v384_v47 }
 0x136   :  { %1644 = vmatprep.mubr.f32.mxu1 %v385_v44 }
 0x139   :  { %1645 = vmatmul.mubr.f32.gmra.mxu1 %v386_v51 }
 0x13a   :  { %1647 = vmatprep.mubr.f32.mxu1 %v387_v49 }
 0x13d   :  { %1648 = vmatmul.mubr.f32.gmra.mxu1 %v388_v55 }
 0x13e   :  { %1650 = vmatprep.mubr.f32.mxu1 %v389_v53 }
 0x141   :  { %1651 = vmatmul.mubr.f32.gmra.mxu1 %v390_v60 }
 0x142   :  { %1653 = vmatprep.mubr.f32.mxu1 %v391_v58 }
 0x145   :  { %1654 = vmatmul.mubr.f32.gmra.mxu1 %v392_v1 }
 0x146   :  { %1656 = vmatprep.mubr.f32.mxu1 %v393_v63 }
 0x149   :  { %1657 = vmatmul.mubr.f32.gmra.mxu1 %v394_v5 }
 0x14a   :  { %1659 = vmatprep.mubr.f32.mxu1 %v395_v3 }
 0x14d   :  { %1660 = vmatmul.mubr.f32.gmra.mxu1 %v396_v9 }
 0x1c5   :  { %v1607_v11 = vpop.f32.mrf.mxu1 }
 0x1c6   :  { %v494_v19 = vadd.f32 %v1607_v11, %v2107_v10 }
 0x1c7   :  { %v488_v12 = vpop.f32.mrf.mxu1 }
 0x1c8   :  { %v489_v13 = vadd.f32 %v2107_v10, %v488_v12  ;;  %v678_v16 = vmax.f32 %v494_v19, 0.0 }
 0x1c9   :  { %v1610_v14 = vpop.f32.mrf.mxu1 }
 0x1ca   :  { %v677_v15 = vmax.f32 %v489_v13, 0.0  ;;  %v504_v17 = vadd.f32 %v1610_v14, %v2107_v10 }
 0x1cb   :  { %v498_v18 = vpop.f32.mrf.mxu1 }
 0x1cc   :  { %v499_v20 = vadd.f32 %v2107_v10, %v498_v18  ;;  %1694 = vmatprep.mubr.f32.mxu0 %v677_v15  ;;  %v680_v24 = vmax.f32 %v504_v17, 0.0 }
 0x1cd   :  { %v1613_v21 = vpop.f32.mrf.mxu1  ;;  %1695 = vmatmul.mubr.f32.vlgmr.msra.gmra.mxu0 %v678_v16 }
 0x1ce   :  { %v679_v22 = vmax.f32 %v499_v20, 0.0  ;;  %v514_v25 = vadd.f32 %v1613_v21, %v2107_v10 }
 0x1cf   :  { %v508_v27 = vpop.f32.mrf.mxu1 }
 0x1d0   :  { %v509_v28 = vadd.f32 %v2107_v10, %v508_v27  ;;  %1697 = vmatprep.mubr.f32.mxu0 %v679_v22  ;;  %v682_v32 = vmax.f32 %v514_v25, 0.0 }
 0x1d1   :  { %v1616_v29 = vpop.f32.mrf.mxu1  ;;  %1698 = vmatmul.mubr.f32.gmra.mxu0 %v680_v24 }
 0x1d2   :  { %v681_v30 = vmax.f32 %v509_v28, 0.0  ;;  %v524_v33 = vadd.f32 %v1616_v29, %v2107_v10 }
 0x1d3   :  { %v518_v34 = vpop.f32.mrf.mxu1 }
 0x1d4   :  { %v519_v35 = vadd.f32 %v2107_v10, %v518_v34  ;;  %1700 = vmatprep.mubr.f32.mxu0 %v681_v30  ;;  %v684_v37 = vmax.f32 %v524_v33, 0.0 }
 0x1d5   :  { %v1619_v26 = vpop.f32.mrf.mxu1  ;;  %1701 = vmatmul.mubr.f32.gmra.mxu0 %v682_v32 }
 0x1d6   :  { %v683_v36 = vmax.f32 %v519_v35, 0.0  ;;  %v534_v39 = vadd.f32 %v1619_v26, %v2107_v10 }
 0x1d7   :  { %v528_v40 = vpop.f32.mrf.mxu1 }
 0x1d8   :  { %v529_v41 = vadd.f32 %v2107_v10, %v528_v40  ;;  %1703 = vmatprep.mubr.f32.mxu0 %v683_v36  ;;  %v686_v23 = vmax.f32 %v534_v39, 0.0 }
 0x1d9   :  { %v1622_v38 = vpop.f32.mrf.mxu1  ;;  %1704 = vmatmul.mubr.f32.gmra.mxu0 %v684_v37 }
 0x1da   :  { %v685_v42 = vmax.f32 %v529_v41, 0.0  ;;  %v544_v43 = vadd.f32 %v1622_v38, %v2107_v10 }
 0x1db   :  { %v538_v44 = vpop.f32.mrf.mxu1 }
 0x1dc   :  { %v539_v46 = vadd.f32 %v2107_v10, %v538_v44  ;;  %1706 = vmatprep.mubr.f32.mxu0 %v685_v42  ;;  %v688_v48 = vmax.f32 %v544_v43, 0.0 }
 0x1dd   :  { %v1625_v47 = vpop.f32.mrf.mxu1  ;;  %1707 = vmatmul.mubr.f32.gmra.mxu0 %v686_v23 }
 0x1de   :  { %v687_v31 = vmax.f32 %v539_v46, 0.0  ;;  %v554_v49 = vadd.f32 %v1625_v47, %v2107_v10 }
 0x1df   :  { %v548_v50 = vpop.f32.mrf.mxu1 }
 0x1e0   :  { %v549_v51 = vadd.f32 %v2107_v10, %v548_v50  ;;  %1709 = vmatprep.mubr.f32.mxu0 %v687_v31  ;;  %v690_v53 = vmax.f32 %v554_v49, 0.0 }
 0x1e1   :  { %v1628_v52 = vpop.f32.mrf.mxu1  ;;  %1710 = vmatmul.mubr.f32.gmra.mxu0 %v688_v48 }
 0x1e2   :  { %v689_v45 = vmax.f32 %v549_v51, 0.0  ;;  %v564_v54 = vadd.f32 %v1628_v52, %v2107_v10 }
 0x1e3   :  { %v558_v55 = vpop.f32.mrf.mxu1 }
 0x1e4   :  { %v559_v56 = vadd.f32 %v2107_v10, %v558_v55  ;;  %1712 = vmatprep.mubr.f32.mxu0 %v689_v45  ;;  %v692_v59 = vmax.f32 %v564_v54, 0.0 }
 0x1e5   :  { %v1631_v57 = vpop.f32.mrf.mxu1  ;;  %1713 = vmatmul.mubr.f32.gmra.mxu0 %v690_v53 }
 0x1e6   :  { %v691_v58 = vmax.f32 %v559_v56, 0.0  ;;  %v574_v60 = vadd.f32 %v1631_v57, %v2107_v10 }
 0x1e7   :  { %v568_v61 = vpop.f32.mrf.mxu1 }
 0x1e8   :  { %v569_v62 = vadd.f32 %v2107_v10, %v568_v61  ;;  %1715 = vmatprep.mubr.f32.mxu0 %v691_v58  ;;  %v694_v1 = vmax.f32 %v574_v60, 0.0 }
 0x1e9   :  { %v1634_v63 = vpop.f32.mrf.mxu1  ;;  %1716 = vmatmul.mubr.f32.gmra.mxu0 %v692_v59 }
 0x1ea   :  { %v693_v0 = vmax.f32 %v569_v62, 0.0  ;;  %v584_v2 = vadd.f32 %v1634_v63, %v2107_v10  ;;  %v2150_v62 = vld [vmem:[%s2198_s2 + $0x2] ss:$0 sm:$0xff]  ;;  %s2010_s2 = smov [#allocation7]  }
 0x1eb   :  { %v578_v3 = vpop.f32.mrf.mxu1  ;;  %s1266_s28 = sshll.u32 %s2010_s2, 4  ;;  %s1267_s28 = int_to_ptr.vmem [resolvable:$true] %s1266_s28 }
 0x1ec   :  { %v579_v4 = vadd.f32 %v2107_v10, %v578_v3  ;;  %1718 = vmatprep.mubr.f32.mxu0 %v693_v0  ;;  %v696_v7 = vmax.f32 %v584_v2, 0.0  ;;  %s1980_s29 = scalar_lea.vmem %s1267_s28, 4864  ;;  %p1985_p11 = scmp.lt.s32.totalorder %s1267_s28, %s1267_s28 }
 0x1ed   :  { %v1637_v5 = vpop.f32.mrf.mxu1  ;;  %1719 = vmatmul.mubr.f32.gmra.mxu0 %v694_v1  ;;  %p1981_p10 = scmp.ne.s32.totalorder %s1267_s28, %s1980_s29  ;;  %p1986_p12 = scmp.lt.s32.totalorder %s1980_s29, %s1980_s29 }
 0x1ee   :  { %v695_v6 = vmax.f32 %v579_v4, 0.0  ;;  %v594_v8 = vadd.f32 %v1637_v5, %v2107_v10 }
 0x1ef   :  { %v588_v9 = vpop.f32.mrf.mxu1  ;;  %p1987_p13 = por %p1986_p12, %p1985_p11 }
 0x1f0   :  { %v589_v11 = vadd.f32 %v2107_v10, %v588_v9  ;;  %1721 = vmatprep.mubr.f32.mxu0 %v695_v6  ;;  %v698_v13 = vmax.f32 %v594_v8, 0.0 }
 0x1f1   :  { %v1640_v19 = vpop.f32.mrf.mxu1  ;;  %1722 = vmatmul.mubr.f32.gmra.mxu0 %v696_v7  ;;  %p1988_p0 = pnand %p1987_p13, %p1981_p10 }
 0x1f2   :  { %v697_v12 = vmax.f32 %v589_v11, 0.0  ;;  %v604_v14 = vadd.f32 %v1640_v19, %v2107_v10 }
 0x1f3   :  { %v598_v15 = vpop.f32.mrf.mxu1 }
 0x1f4   :  { %v599_v16 = vadd.f32 %v2107_v10, %v598_v15  ;;  %1724 = vmatprep.mubr.f32.mxu0 %v697_v12  ;;  %v700_v20 = vmax.f32 %v604_v14, 0.0 }
 0x1f5   :  { %v1643_v17 = vpop.f32.mrf.mxu1  ;;  %1725 = vmatmul.mubr.f32.gmra.mxu0 %v698_v13 }
 0x1f6   :  { %v699_v18 = vmax.f32 %v599_v16, 0.0  ;;  %v614_v21 = vadd.f32 %v1643_v17, %v2107_v10 }
 0x1f7   :  { %v608_v22 = vpop.f32.mrf.mxu1 }
 0x1f8   :  { %v609_v24 = vadd.f32 %v2107_v10, %v608_v22  ;;  %1727 = vmatprep.mubr.f32.mxu0 %v699_v18  ;;  %v702_v28 = vmax.f32 %v614_v21, 0.0 }
 0x1f9   :  { %v1646_v25 = vpop.f32.mrf.mxu1  ;;  %1728 = vmatmul.mubr.f32.gmra.mxu0 %v700_v20 }
 0x1fa   :  { %v701_v27 = vmax.f32 %v609_v24, 0.0  ;;  %v624_v29 = vadd.f32 %v1646_v25, %v2107_v10 }
 0x1fb   :  { %v618_v30 = vpop.f32.mrf.mxu1 }
 0x1fc   :  { %v619_v32 = vadd.f32 %v2107_v10, %v618_v30  ;;  %1730 = vmatprep.mubr.f32.mxu0 %v701_v27  ;;  %v704_v35 = vmax.f32 %v624_v29, 0.0 }
 0x1fd   :  { %v1649_v33 = vpop.f32.mrf.mxu1  ;;  %1731 = vmatmul.mubr.f32.gmra.mxu0 %v702_v28 }
 0x1fe   :  { %v703_v34 = vmax.f32 %v619_v32, 0.0  ;;  %v634_v26 = vadd.f32 %v1649_v33, %v2107_v10 }
 0x1ff   :  { %v628_v36 = vpop.f32.mrf.mxu1 }
 0x200   :  { %v629_v37 = vadd.f32 %v2107_v10, %v628_v36  ;;  %1733 = vmatprep.mubr.f32.mxu0 %v703_v34  ;;  %v706_v41 = vmax.f32 %v634_v26, 0.0 }
 0x201   :  { %v1652_v39 = vpop.f32.mrf.mxu1  ;;  %1734 = vmatmul.mubr.f32.gmra.mxu0 %v704_v35 }
 0x202   :  { %v705_v40 = vmax.f32 %v629_v37, 0.0  ;;  %v644_v38 = vadd.f32 %v1652_v39, %v2107_v10 }
 0x203   :  { %v638_v42 = vpop.f32.mrf.mxu1 }
 0x204   :  { %v639_v23 = vadd.f32 %v2107_v10, %v638_v42  ;;  %1736 = vmatprep.mubr.f32.mxu0 %v705_v40  ;;  %v708_v46 = vmax.f32 %v644_v38, 0.0 }
 0x205   :  { %v1655_v43 = vpop.f32.mrf.mxu1  ;;  %1737 = vmatmul.mubr.f32.gmra.mxu0 %v706_v41 }
 0x206   :  { %v707_v44 = vmax.f32 %v639_v23, 0.0  ;;  %v654_v47 = vadd.f32 %v1655_v43, %v2107_v10 }
 0x207   :  { %v648_v31 = vpop.f32.mrf.mxu1 }
 0x208   :  { %v649_v48 = vadd.f32 %v2107_v10, %v648_v31  ;;  %1739 = vmatprep.mubr.f32.mxu0 %v707_v44  ;;  %v710_v51 = vmax.f32 %v654_v47, 0.0 }
 0x209   :  { %v1658_v49 = vpop.f32.mrf.mxu1  ;;  %1740 = vmatmul.mubr.f32.gmra.mxu0 %v708_v46 }
 0x20a   :  { %v709_v50 = vmax.f32 %v649_v48, 0.0  ;;  %v664_v52 = vadd.f32 %v1658_v49, %v2107_v10 }
 0x20b   :  { %v658_v45 = vpop.f32.mrf.mxu1 }
 0x20c   :  { %v659_v53 = vadd.f32 %v2107_v10, %v658_v45  ;;  %1742 = vmatprep.mubr.f32.mxu0 %v709_v50  ;;  %v712_v56 = vmax.f32 %v664_v52, 0.0 }
 0x20d   :  { %v1661_v54 = vpop.f32.mrf.mxu1  ;;  %1743 = vmatmul.mubr.f32.gmra.mxu0 %v710_v51 }
 0x20e   :  { %v711_v55 = vmax.f32 %v659_v53, 0.0  ;;  %v674_v57 = vadd.f32 %v1661_v54, %v2107_v10 }
 0x20f   :  { %v668_v58 = vpop.f32.mrf.mxu1 }
 0x210   :  { %v669_v59 = vadd.f32 %v2107_v10, %v668_v58  ;;  %1745 = vmatprep.mubr.f32.mxu0 %v711_v55  ;;  %v714_v61 = vmax.f32 %v674_v57, 0.0 }
 0x211   :  { %1746 = vmatmul.mubr.f32.gmra.mxu0 %v712_v56 }
 0x212   :  { %v713_v60 = vmax.f32 %v669_v59, 0.0 }
 0x214   :  { %1748 = vmatprep.mubr.f32.mxu0 %v713_v60 }
 0x215   :  { %1749 = vmatmul.mubr.f32.gmra.mxu0 %v714_v61 }
 0x28d   :  { %v1696_v63 = vpop.f32.mrf.mxu0 }
 0x28e   :  { %v812_v0 = vadd.f32 %v1696_v63, %v2150_v62 }
 0x28f   :  { %v806_v1 = vpop.f32.mrf.mxu0 }
 0x290   :  { %v1285_v2 = vmul.f32 -1.442695, %v812_v0  ;;  %v807_v3 = vadd.f32 %v2150_v62, %v806_v1 }
 0x291   :  { %v1699_v4 = vpop.f32.mrf.mxu0 }
 0x292   :  { %1788 = vpow2.f32 %v1285_v2  ;;  %v1284_v10 = vmul.f32 -1.442695, %v807_v3  ;;  %v822_v5 = vadd.f32 %v1699_v4, %v2150_v62 }
 0x293   :  { %v816_v6 = vpop.f32.mrf.mxu0 }
 0x294   :  { %1790 = vpow2.f32 %v1284_v10  ;;  %v1287_v7 = vmul.f32 -1.442695, %v822_v5  ;;  %v817_v8 = vadd.f32 %v2150_v62, %v816_v6 }
 0x295   :  { %v1702_v9 = vpop.f32.mrf.mxu0 }
 0x296   :  { %1792 = vpow2.f32 %v1287_v7  ;;  %v1286_v11 = vmul.f32 -1.442695, %v817_v8  ;;  %v832_v19 = vadd.f32 %v1702_v9, %v2150_v62 }
 0x297   :  { %v826_v12 = vpop.f32.mrf.mxu0 }
 0x298   :  { %1794 = vpow2.f32 %v1286_v11  ;;  %v1289_v13 = vmul.f32 -1.442695, %v832_v19  ;;  %v827_v14 = vadd.f32 %v2150_v62, %v826_v12 }
 0x299   :  { %v1705_v15 = vpop.f32.mrf.mxu0 }
 0x29a   :  { %1796 = vpow2.f32 %v1289_v13  ;;  %v1288_v16 = vmul.f32 -1.442695, %v827_v14  ;;  %v842_v17 = vadd.f32 %v1705_v15, %v2150_v62 }
 0x29b   :  { %v836_v18 = vpop.f32.mrf.mxu0 }
 0x29c   :  { %1798 = vpow2.f32 %v1288_v16  ;;  %v1291_v20 = vmul.f32 -1.442695, %v842_v17  ;;  %v837_v21 = vadd.f32 %v2150_v62, %v836_v18 }
 0x29d   :  { %v1708_v22 = vpop.f32.mrf.mxu0 }
 0x29e   :  { %1800 = vpow2.f32 %v1291_v20  ;;  %v1290_v24 = vmul.f32 -1.442695, %v837_v21  ;;  %v852_v25 = vadd.f32 %v1708_v22, %v2150_v62 }
 0x29f   :  { %v1789_v27 = vpop.eup %1788  ;;  %v846_v28 = vpop.f32.mrf.mxu0 }
 0x2a0   :  { %v1110_v29 = vadd.f32 1.0, %v1789_v27  ;;  %1802 = vpow2.f32 %v1290_v24  ;;  %v1293_v30 = vmul.f32 -1.442695, %v852_v25  ;;  %v847_v32 = vadd.f32 %v2150_v62, %v846_v28 }
 0x2a1   :  { %v1791_v33 = vpop.eup %1790  ;;  %v1711_v34 = vpop.f32.mrf.mxu0 }
 0x2a2   :  { %1804 = vrcp.f32 %v1110_v29  ;;  %v1109_v35 = vadd.f32 1.0, %v1791_v33  ;;  %v1292_v26 = vmul.f32 -1.442695, %v847_v32  ;;  %v862_v36 = vadd.f32 %v1711_v34, %v2150_v62 }
 0x2a3   :  { %v1793_v37 = vpop.eup %1792  ;;  %1806 = vpow2.f32 %v1293_v30  ;;  %v856_v39 = vpop.f32.mrf.mxu0 }
 0x2a4   :  { %1808 = vrcp.f32 %v1109_v35  ;;  %v1112_v40 = vadd.f32 1.0, %v1793_v37  ;;  %v1295_v41 = vmul.f32 -1.442695, %v862_v36  ;;  %v857_v38 = vadd.f32 %v2150_v62, %v856_v39 }
 0x2a5   :  { %v1795_v42 = vpop.eup %1794  ;;  %1810 = vpow2.f32 %v1292_v26  ;;  %v1714_v23 = vpop.f32.mrf.mxu0 }
 0x2a6   :  { %1812 = vrcp.f32 %v1112_v40  ;;  %v1111_v43 = vadd.f32 1.0, %v1795_v42  ;;  %v1294_v44 = vmul.f32 -1.442695, %v857_v38  ;;  %v872_v46 = vadd.f32 %v1714_v23, %v2150_v62 }
 0x2a7   :  { %v1797_v47 = vpop.eup %1796  ;;  %1814 = vpow2.f32 %v1295_v41  ;;  %v866_v31 = vpop.f32.mrf.mxu0 }
 0x2a8   :  { %1816 = vrcp.f32 %v1111_v43  ;;  %v1114_v48 = vadd.f32 1.0, %v1797_v47  ;;  %v1297_v49 = vmul.f32 -1.442695, %v872_v46  ;;  %v867_v50 = vadd.f32 %v2150_v62, %v866_v31 }
 0x2a9   :  { %v1799_v51 = vpop.eup %1798  ;;  %1818 = vpow2.f32 %v1294_v44  ;;  %v1717_v52 = vpop.f32.mrf.mxu0 }
 0x2aa   :  { %1820 = vrcp.f32 %v1114_v48  ;;  %v1113_v45 = vadd.f32 1.0, %v1799_v51  ;;  %v1296_v53 = vmul.f32 -1.442695, %v867_v50  ;;  %v882_v54 = vadd.f32 %v1717_v52, %v2150_v62 }
 0x2ab   :  { %v1801_v55 = vpop.eup %1800  ;;  %1822 = vpow2.f32 %v1297_v49  ;;  %v876_v56 = vpop.f32.mrf.mxu0 }
 0x2ac   :  { %1824 = vrcp.f32 %v1113_v45  ;;  %v1116_v57 = vadd.f32 1.0, %v1801_v55  ;;  %v1299_v58 = vmul.f32 -1.442695, %v882_v54  ;;  %v877_v59 = vadd.f32 %v2150_v62, %v876_v56 }
 0x2ad   :  { %v1803_v60 = vpop.eup %1802  ;;  %1826 = vpow2.f32 %v1296_v53  ;;  %v1720_v61 = vpop.f32.mrf.mxu0 }
 0x2ae   :  { %1828 = vrcp.f32 %v1116_v57  ;;  %v1115_v63 = vadd.f32 1.0, %v1803_v60  ;;  %v1298_v0 = vmul.f32 -1.442695, %v877_v59  ;;  %v892_v1 = vadd.f32 %v1720_v61, %v2150_v62 }
 0x2af   :  { %v1805_v2 = vpop.eup %1804  ;;  %1830 = vpow2.f32 %v1299_v58  ;;  %v886_v3 = vpop.f32.mrf.mxu0 }
 0x2b0   :  { %v1807_v4 = vpop.eup %1806  ;;  %1224 = vst [vmem:[#allocation7 + $0x8] sm:$0xff] %v1805_v2  ;;  %1832 = vrcp.f32 %v1115_v63  ;;  %v1301_v10 = vmul.f32 -1.442695, %v892_v1  ;;  %v887_v5 = vadd.f32 %v2150_v62, %v886_v3 }
 0x2b1   :  { %v1809_v6 = vpop.eup %1808  ;;  %v1118_v7 = vadd.f32 1.0, %v1807_v4  ;;  %1834 = vpow2.f32 %v1298_v0  ;;  %v1723_v8 = vpop.f32.mrf.mxu0 }
 0x2b2   :  { %v1811_v9 = vpop.eup %1810  ;;  %1223 = vst [vmem:[#allocation7] sm:$0xff] %v1809_v6  ;;  %1836 = vpow2.f32 %v1301_v10  ;;  %v1300_v11 = vmul.f32 -1.442695, %v887_v5  ;;  %v902_v19 = vadd.f32 %v1723_v8, %v2150_v62 }
 0x2b3   :  { %v1813_v12 = vpop.eup %1812  ;;  %1838 = vrcp.f32 %v1118_v7  ;;  %v1117_v13 = vadd.f32 1.0, %v1811_v9  ;;  %v896_v14 = vpop.f32.mrf.mxu0 }
 0x2b4   :  { %v1815_v15 = vpop.eup %1814  ;;  %1226 = vst [vmem:[#allocation7 + $0x18] sm:$0xff] %v1813_v12  ;;  %1840 = vpow2.f32 %v1300_v11  ;;  %v1303_v16 = vmul.f32 -1.442695, %v902_v19  ;;  %v897_v17 = vadd.f32 %v2150_v62, %v896_v14 }
 0x2b5   :  { %v1817_v18 = vpop.eup %1816  ;;  %1842 = vrcp.f32 %v1117_v13  ;;  %v1120_v20 = vadd.f32 1.0, %v1815_v15  ;;  %v1726_v21 = vpop.f32.mrf.mxu0 }
 0x2b6   :  { %v1819_v22 = vpop.eup %1818  ;;  %1225 = vst [vmem:[#allocation7 + $0x10] sm:$0xff] %v1817_v18  ;;  %1844 = vpow2.f32 %v1303_v16  ;;  %v1302_v24 = vmul.f32 -1.442695, %v897_v17  ;;  %v912_v25 = vadd.f32 %v1726_v21, %v2150_v62 }
 0x2b7   :  { %v1821_v27 = vpop.eup %1820  ;;  %1846 = vrcp.f32 %v1120_v20  ;;  %v1119_v28 = vadd.f32 1.0, %v1819_v22  ;;  %v906_v29 = vpop.f32.mrf.mxu0 }
 0x2b8   :  { %v1823_v30 = vpop.eup %1822  ;;  %1228 = vst [vmem:[#allocation7 + $0x28] sm:$0xff] %v1821_v27  ;;  %1848 = vpow2.f32 %v1302_v24  ;;  %v1305_v32 = vmul.f32 -1.442695, %v912_v25  ;;  %v907_v33 = vadd.f32 %v2150_v62, %v906_v29 }
 0x2b9   :  { %v1825_v34 = vpop.eup %1824  ;;  %1850 = vrcp.f32 %v1119_v28  ;;  %v1122_v35 = vadd.f32 1.0, %v1823_v30  ;;  %v1729_v26 = vpop.f32.mrf.mxu0 }
 0x2ba   :  { %v1827_v36 = vpop.eup %1826  ;;  %1227 = vst [vmem:[#allocation7 + $0x20] sm:$0xff] %v1825_v34  ;;  %1852 = vpow2.f32 %v1305_v32  ;;  %v1304_v37 = vmul.f32 -1.442695, %v907_v33  ;;  %v922_v39 = vadd.f32 %v1729_v26, %v2150_v62 }
 0x2bb   :  { %v1829_v40 = vpop.eup %1828  ;;  %1854 = vrcp.f32 %v1122_v35  ;;  %v1121_v41 = vadd.f32 1.0, %v1827_v36  ;;  %v916_v38 = vpop.f32.mrf.mxu0 }
 0x2bc   :  { %v1831_v42 = vpop.eup %1830  ;;  %1230 = vst [vmem:[#allocation7 + $0x38] sm:$0xff] %v1829_v40  ;;  %1856 = vpow2.f32 %v1304_v37  ;;  %v1307_v23 = vmul.f32 -1.442695, %v922_v39  ;;  %v917_v43 = vadd.f32 %v2150_v62, %v916_v38 }
 0x2bd   :  { %v1833_v44 = vpop.eup %1832  ;;  %1858 = vrcp.f32 %v1121_v41  ;;  %v1124_v46 = vadd.f32 1.0, %v1831_v42  ;;  %v1732_v47 = vpop.f32.mrf.mxu0 }
 0x2be   :  { %v1835_v31 = vpop.eup %1834  ;;  %1229 = vst [vmem:[#allocation7 + $0x30] sm:$0xff] %v1833_v44  ;;  %1860 = vpow2.f32 %v1307_v23  ;;  %v1306_v48 = vmul.f32 -1.442695, %v917_v43  ;;  %v932_v49 = vadd.f32 %v1732_v47, %v2150_v62 }
 0x2bf   :  { %v1837_v50 = vpop.eup %1836  ;;  %1862 = vrcp.f32 %v1124_v46  ;;  %v1123_v51 = vadd.f32 1.0, %v1835_v31  ;;  %v926_v52 = vpop.f32.mrf.mxu0 }
 0x2c0   :  { %v1839_v45 = vpop.eup %1838  ;;  %v1126_v53 = vadd.f32 1.0, %v1837_v50  ;;  %1864 = vpow2.f32 %v1306_v48  ;;  %v1309_v54 = vmul.f32 -1.442695, %v932_v49  ;;  %v927_v55 = vadd.f32 %v2150_v62, %v926_v52 }
 0x2c1   :  { %v1841_v56 = vpop.eup %1840  ;;  %1232 = vst [vmem:[#allocation7 + $0x48] sm:$0xff] %v1839_v45  ;;  %1866 = vrcp.f32 %v1123_v51  ;;  %v1735_v57 = vpop.f32.mrf.mxu0 }
 0x2c2   :  { %v1843_v58 = vpop.eup %1842  ;;  %1868 = vrcp.f32 %v1126_v53  ;;  %v1125_v59 = vadd.f32 1.0, %v1841_v56  ;;  %v1308_v60 = vmul.f32 -1.442695, %v927_v55  ;;  %v942_v61 = vadd.f32 %v1735_v57, %v2150_v62 }
 0x2c3   :  { %v1845_v63 = vpop.eup %1844  ;;  %1231 = vst [vmem:[#allocation7 + $0x40] sm:$0xff] %v1843_v58  ;;  %1870 = vpow2.f32 %v1309_v54  ;;  %v936_v0 = vpop.f32.mrf.mxu0 }
 0x2c4   :  { %v1847_v1 = vpop.eup %1846  ;;  %1872 = vrcp.f32 %v1125_v59  ;;  %v1128_v2 = vadd.f32 1.0, %v1845_v63  ;;  %v1311_v3 = vmul.f32 -1.442695, %v942_v61  ;;  %v937_v4 = vadd.f32 %v2150_v62, %v936_v0 }
 0x2c5   :  { %v1849_v10 = vpop.eup %1848  ;;  %1234 = vst [vmem:[#allocation7 + $0x58] sm:$0xff] %v1847_v1  ;;  %1874 = vpow2.f32 %v1308_v60  ;;  %v1738_v5 = vpop.f32.mrf.mxu0 }
 0x2c6   :  { %v1851_v6 = vpop.eup %1850  ;;  %1876 = vrcp.f32 %v1128_v2  ;;  %v1127_v7 = vadd.f32 1.0, %v1849_v10  ;;  %v1310_v8 = vmul.f32 -1.442695, %v937_v4  ;;  %v952_v9 = vadd.f32 %v1738_v5, %v2150_v62 }
 0x2c7   :  { %v1853_v11 = vpop.eup %1852  ;;  %1233 = vst [vmem:[#allocation7 + $0x50] sm:$0xff] %v1851_v6  ;;  %1878 = vpow2.f32 %v1311_v3  ;;  %v946_v19 = vpop.f32.mrf.mxu0 }
 0x2c8   :  { %v1855_v12 = vpop.eup %1854  ;;  %1880 = vrcp.f32 %v1127_v7  ;;  %v1130_v13 = vadd.f32 1.0, %v1853_v11  ;;  %v1313_v14 = vmul.f32 -1.442695, %v952_v9  ;;  %v947_v15 = vadd.f32 %v2150_v62, %v946_v19 }
 0x2c9   :  { %v1857_v16 = vpop.eup %1856  ;;  %1236 = vst [vmem:[#allocation7 + $0x68] sm:$0xff] %v1855_v12  ;;  %1882 = vpow2.f32 %v1310_v8  ;;  %v1741_v17 = vpop.f32.mrf.mxu0 }
 0x2ca   :  { %v1859_v18 = vpop.eup %1858  ;;  %1884 = vrcp.f32 %v1130_v13  ;;  %v1129_v20 = vadd.f32 1.0, %v1857_v16  ;;  %v1312_v21 = vmul.f32 -1.442695, %v947_v15  ;;  %v962_v22 = vadd.f32 %v1741_v17, %v2150_v62 }
 0x2cb   :  { %v1861_v24 = vpop.eup %1860  ;;  %1235 = vst [vmem:[#allocation7 + $0x60] sm:$0xff] %v1859_v18  ;;  %1886 = vpow2.f32 %v1313_v14  ;;  %v956_v25 = vpop.f32.mrf.mxu0 }
 0x2cc   :  { %v1863_v27 = vpop.eup %1862  ;;  %1888 = vrcp.f32 %v1129_v20  ;;  %v1132_v28 = vadd.f32 1.0, %v1861_v24  ;;  %v1315_v29 = vmul.f32 -1.442695, %v962_v22  ;;  %v957_v30 = vadd.f32 %v2150_v62, %v956_v25 }
 0x2cd   :  { %v1865_v32 = vpop.eup %1864  ;;  %1238 = vst [vmem:[#allocation7 + $0x78] sm:$0xff] %v1863_v27  ;;  %1890 = vpow2.f32 %v1312_v21  ;;  %v1744_v33 = vpop.f32.mrf.mxu0 }
 0x2ce   :  { %v1867_v34 = vpop.eup %1866  ;;  %1892 = vrcp.f32 %v1132_v28  ;;  %v1131_v35 = vadd.f32 1.0, %v1865_v32  ;;  %v1314_v26 = vmul.f32 -1.442695, %v957_v30  ;;  %v972_v36 = vadd.f32 %v1744_v33, %v2150_v62 }
 0x2cf   :  { %v1869_v37 = vpop.eup %1868  ;;  %1237 = vst [vmem:[#allocation7 + $0x70] sm:$0xff] %v1867_v34  ;;  %1894 = vpow2.f32 %v1315_v29  ;;  %v966_v39 = vpop.f32.mrf.mxu0 }
 0x2d0   :  { %v1871_v40 = vpop.eup %1870  ;;  %1240 = vst [vmem:[#allocation7 + $0x88] sm:$0xff] %v1869_v37  ;;  %1896 = vrcp.f32 %v1131_v35  ;;  %v1317_v41 = vmul.f32 -1.442695, %v972_v36  ;;  %v967_v38 = vadd.f32 %v2150_v62, %v966_v39 }
 0x2d1   :  { %v1873_v42 = vpop.eup %1872  ;;  %v1134_v23 = vadd.f32 1.0, %v1871_v40  ;;  %1898 = vpow2.f32 %v1314_v26  ;;  %v1747_v43 = vpop.f32.mrf.mxu0 }
 0x2d2   :  { %v1875_v44 = vpop.eup %1874  ;;  %1239 = vst [vmem:[#allocation7 + $0x80] sm:$0xff] %v1873_v42  ;;  %1900 = vpow2.f32 %v1317_v41  ;;  %v1316_v46 = vmul.f32 -1.442695, %v967_v38  ;;  %v982_v47 = vadd.f32 %v1747_v43, %v2150_v62 }
 0x2d3   :  { %v1877_v31 = vpop.eup %1876  ;;  %1902 = vrcp.f32 %v1134_v23  ;;  %v1133_v48 = vadd.f32 1.0, %v1875_v44  ;;  %v976_v49 = vpop.f32.mrf.mxu0 }
 0x2d4   :  { %v1879_v50 = vpop.eup %1878  ;;  %1242 = vst [vmem:[#allocation7 + $0x98] sm:$0xff] %v1877_v31  ;;  %1904 = vpow2.f32 %v1316_v46  ;;  %v1319_v51 = vmul.f32 -1.442695, %v982_v47  ;;  %v977_v52 = vadd.f32 %v2150_v62, %v976_v49 }
 0x2d5   :  { %v1881_v45 = vpop.eup %1880  ;;  %1906 = vrcp.f32 %v1133_v48  ;;  %v1136_v53 = vadd.f32 1.0, %v1879_v50  ;;  %v1750_v54 = vpop.f32.mrf.mxu0 }
 0x2d6   :  { %v1883_v55 = vpop.eup %1882  ;;  %1241 = vst [vmem:[#allocation7 + $0x90] sm:$0xff] %v1881_v45  ;;  %1908 = vpow2.f32 %v1319_v51  ;;  %v1318_v56 = vmul.f32 -1.442695, %v977_v52  ;;  %v992_v57 = vadd.f32 %v1750_v54, %v2150_v62 }
 0x2d7   :  { %v1885_v58 = vpop.eup %1884  ;;  %1910 = vrcp.f32 %v1136_v53  ;;  %v1135_v59 = vadd.f32 1.0, %v1883_v55  ;;  %v986_v60 = vpop.f32.mrf.mxu0 }
 0x2d8   :  { %v1887_v61 = vpop.eup %1886  ;;  %1244 = vst [vmem:[#allocation7 + $0xa8] sm:$0xff] %v1885_v58  ;;  %1912 = vpow2.f32 %v1318_v56  ;;  %v1321_v63 = vmul.f32 -1.442695, %v992_v57  ;;  %v987_v0 = vadd.f32 %v2150_v62, %v986_v60 }
 0x2d9   :  { %v1889_v1 = vpop.eup %1888  ;;  %1914 = vrcp.f32 %v1135_v59  ;;  %v1138_v2 = vadd.f32 1.0, %v1887_v61 }
 0x2da   :  { %v1891_v3 = vpop.eup %1890  ;;  %1243 = vst [vmem:[#allocation7 + $0xa0] sm:$0xff] %v1889_v1  ;;  %1916 = vpow2.f32 %v1321_v63  ;;  %v1320_v4 = vmul.f32 -1.442695, %v987_v0 }
 0x2db   :  { %v1893_v10 = vpop.eup %1892  ;;  %1918 = vrcp.f32 %v1138_v2  ;;  %v1137_v5 = vadd.f32 1.0, %v1891_v3 }
 0x2dc   :  { %v1895_v6 = vpop.eup %1894  ;;  %1246 = vst [vmem:[#allocation7 + $0xb8] sm:$0xff] %v1893_v10  ;;  %1920 = vpow2.f32 %v1320_v4 }
 0x2dd   :  { %v1897_v7 = vpop.eup %1896  ;;  %1922 = vrcp.f32 %v1137_v5  ;;  %v1140_v8 = vadd.f32 1.0, %v1895_v6 }
 0x2de   :  { %v1899_v9 = vpop.eup %1898  ;;  %1245 = vst [vmem:[#allocation7 + $0xb0] sm:$0xff] %v1897_v7 }
 0x2df   :  { %v1901_v11 = vpop.eup %1900  ;;  %1924 = vrcp.f32 %v1140_v8  ;;  %v1139_v62 = vadd.f32 1.0, %v1899_v9 }
 0x2e0   :  { %v1903_v19 = vpop.eup %1902  ;;  %v1142_v12 = vadd.f32 1.0, %v1901_v11 }
 0x2e1   :  { %v1905_v13 = vpop.eup %1904  ;;  %1248 = vst [vmem:[#allocation7 + $0xc8] sm:$0xff] %v1903_v19  ;;  %1926 = vrcp.f32 %v1139_v62 }
 0x2e2   :  { %v1907_v14 = vpop.eup %1906  ;;  %1928 = vrcp.f32 %v1142_v12  ;;  %v1141_v15 = vadd.f32 1.0, %v1905_v13 }
 0x2e3   :  { %v1909_v16 = vpop.eup %1908  ;;  %1247 = vst [vmem:[#allocation7 + $0xc0] sm:$0xff] %v1907_v14 }
 0x2e4   :  { %v1911_v17 = vpop.eup %1910  ;;  %1930 = vrcp.f32 %v1141_v15  ;;  %v1144_v18 = vadd.f32 1.0, %v1909_v16 }
 0x2e5   :  { %v1913_v20 = vpop.eup %1912  ;;  %1250 = vst [vmem:[#allocation7 + $0xd8] sm:$0xff] %v1911_v17 }
 0x2e6   :  { %v1915_v21 = vpop.eup %1914  ;;  %1932 = vrcp.f32 %v1144_v18  ;;  %v1143_v22 = vadd.f32 1.0, %v1913_v20 }
 0x2e7   :  { %v1917_v24 = vpop.eup %1916  ;;  %1249 = vst [vmem:[#allocation7 + $0xd0] sm:$0xff] %v1915_v21 }
 0x2e8   :  { %v1919_v25 = vpop.eup %1918  ;;  %1934 = vrcp.f32 %v1143_v22  ;;  %v1146_v27 = vadd.f32 1.0, %v1917_v24 }
 0x2e9   :  { %v1921_v28 = vpop.eup %1920  ;;  %1252 = vst [vmem:[#allocation7 + $0xe8] sm:$0xff] %v1919_v25 }
 0x2ea   :  { %v1923_v29 = vpop.eup %1922  ;;  %1936 = vrcp.f32 %v1146_v27  ;;  %v1145_v30 = vadd.f32 1.0, %v1921_v28 }
 0x2eb   :  { %1251 = vst [vmem:[#allocation7 + $0xe0] sm:$0xff] %v1923_v29 }
 0x2ec   :  { %v1925_v32 = vpop.eup %1924  ;;  %1938 = vrcp.f32 %v1145_v30 }
 0x2ed   :  { %1254 = vst [vmem:[#allocation7 + $0xf8] sm:$0xff] %v1925_v32 }
 0x2ee   :  { %v1927_v33 = vpop.eup %1926 }
 0x2ef   :  { %v1929_v34 = vpop.eup %1928  ;;  %1253 = vst [vmem:[#allocation7 + $0xf0] sm:$0xff] %v1927_v33 }
 0x2f0   :  { %1256 = vst [vmem:[#allocation7 + $0x108] sm:$0xff] %v1929_v34 }
 0x2f1   :  { %v1931_v35 = vpop.eup %1930 }
 0x2f2   :  { %1255 = vst [vmem:[#allocation7 + $0x100] sm:$0xff] %v1931_v35 }
 0x2f3   :  { %v1933_v26 = vpop.eup %1932 }
 0x2f4   :  { %1258 = vst [vmem:[#allocation7 + $0x118] sm:$0xff] %v1933_v26 }
 0x2f5   :  { %v1935_v36 = vpop.eup %1934 }
 0x2f6   :  { %1257 = vst [vmem:[#allocation7 + $0x110] sm:$0xff] %v1935_v36 }
 0x2f7   :  { %v1937_v37 = vpop.eup %1936 }
 0x2f8   :  { %1260 = vst [vmem:[#allocation7 + $0x128] sm:$0xff] %v1937_v37 }
 0x2f9   :  { %v1939_v39 = vpop.eup %1938 }
 0x2fa   :  { %1259 = vst [vmem:[#allocation7 + $0x120] sm:$0xff] %v1939_v39 }
 0x2fb   :  { %1991 = shalt.err (!%p1988_p0)
}
 0x2fc   :  { %1272 = dma.vmem_to_hbm [thread:$0]  %s1267_s28, 4864, %s2199_s3, [#allocation4], %s2007_s15, %s2007_s15, %s2008_s16  }
 0x2fd   :  { %2004 = dma.done.wait [#allocation4], 4864  }
 0x2fe   :  { %2005 = vsyncadd [#allocation4], 4294962432 }
 0x2ff   :  { %1276 = vsyncpa [#allocation3], 1 }
 0x300   :  { %1277 = vsyncpa [#allocation6], 1 }
 0x301   :  { %1278 = vsyncpa [#allocation4], 1 }

</bundles_post_ra>
